<compile_context>
chip_gen: v7x
topology: tpu7x:2x2x1
jax: 0.10.0
libtpu: 0.0.40
codegen_flags: <defaults>
</compile_context>

<pallas_src>
import functools

import jax
import jax.numpy as jnp
from jax import lax
from jax.experimental import pallas as pl
from jax.experimental.pallas import tpu as pltpu


_LANES = 128
_VMEM_LIMIT = 48 * 1024 * 1024   # explicit scoped-VMEM budget; fits v5e/v6e/v7x physical


def _round_up(x, m):
    return ((x + m - 1) // m) * m


def _stage1_tile(b, preferred=512):
    """Row tile for the prep kernel: divides B and is a multiple of 8 (or B itself)."""
    if b <= preferred:
        return b
    for t in (512, 256, 128, 64, 32, 16, 8):
        if b % t == 0:
            return t
    # TODO(synk): large batch not divisible by 8 falls back to a single block; pad B instead
    # if this shape ever shows up in practice.
    return b


def _stage2_plan(n, d):
    """Return (n_pad, tm, tn): lane-dense padded extent and tiles that divide it."""
    target = 512 if d <= 4096 else 256   # keep double-buffered (tile, D) operands in budget
    if n <= target:
        t = _round_up(max(n, _LANES), _LANES)
        return t, t, t
    n_pad = _round_up(n, 256)
    t = target if n_pad % target == 0 else 256
    return n_pad, t, t


# ---------------------------------------------------------------------------
# Stage 1: L2-normalize both views, cast to bf16 for the MXU, and emit the
# per-anchor cosine-space semihard window parameters.
# ---------------------------------------------------------------------------
def _prep_kernel(ref_ref, query_ref, e_out, lo_out, hi_out, mpd_out, *, margin):
    r = ref_ref[...].astype(jnp.float32)
    q = query_ref[...].astype(jnp.float32)

    # F.normalize(p=2, dim=1): x * rsqrt(max(||x||^2, 1e-24))   (rsqrt -> EUP slot)
    r_n = r * lax.rsqrt(jnp.maximum(jnp.sum(r * r, axis=1, keepdims=True), 1e-24))
    q_n = q * lax.rsqrt(jnp.maximum(jnp.sum(q * q, axis=1, keepdims=True), 1e-24))

    r_b = r_n.astype(jnp.bfloat16)
    q_b = q_n.astype(jnp.bfloat16)
    e_out[0, :, :] = r_b
    e_out[1, :, :] = q_b

    # Positive-pair cosine / distance from the same bf16-rounded operands that feed the MXU.
    pos = jnp.sum(r_b.astype(jnp.float32) * q_b.astype(jnp.float32), axis=1, keepdims=True)
    d_ap = jnp.sqrt(jnp.maximum(2.0 - 2.0 * pos, 0.0))

    lo = 1.0 - 0.5 * (d_ap + margin) * (d_ap + margin)   # s > lo  <=>  d_an < d_ap + margin
    hi = pos                                             # s < hi  <=>  d_an > d_ap
    mpd = d_ap + margin                                  # per-triplet loss = mpd - d_an

    for out_ref, val in ((lo_out, lo), (hi_out, hi), (mpd_out, mpd)):
        out_ref[0, :, :] = val    # anchor i (ref half)
        out_ref[1, :, :] = val    # anchor i+B (query half) shares the same positive distance


# ---------------------------------------------------------------------------
# Stage 2: tiled semihard triplet-margin reduction over the (N_pad, N_pad)
# cosine matrix. Rows = anchors (parallel), columns = candidate negatives
# (reduction axis, "arbitrary").
# ---------------------------------------------------------------------------
def _triplet_kernel(lo_ref, hi_ref, mpd_ref, a_ref, b_ref, sum_ref, cnt_ref,
                    accd_ref, accc_ref, *, batch, n_valid, tm, tn):
    i = pl.program_id(0)          # anchor (row) block
    j = pl.program_id(1)          # candidate-negative (column) block -- reduction axis

    @pl.when(j == 0)
    def _init():
        accd_ref[...] = jnp.zeros_like(accd_ref)
        accc_ref[...] = jnp.zeros_like(accc_ref)

    # (tm, tn) cosine tile on the MXU (bf16 operands, f32 accumulation). The A.B^T
    # contraction-on-last-dims form is the canonical attention pattern on Mosaic.
    s = lax.dot_general(a_ref[...], b_ref[...],
                        dimension_numbers=(((1,), (1,)), ((), ())),
                        preferred_element_type=jnp.float32)

    # Semihard window directly in similarity space: no per-element d_ap broadcast/diff temp.
    window = jnp.logical_and(s > lo_ref[...], s < hi_ref[...])
    d_an = jnp.sqrt(jnp.maximum(2.0 - 2.0 * s, 0.0))        # sqrt -> EUP (otherwise idle)

    def _accum(mask):
        md = jnp.where(mask, d_an, 0.0)
        mc = mask.astype(jnp.float32)
        acc_d = accd_ref[...]
        acc_c = accc_ref[...]
        for c in range(tn // _LANES):                        # lane-dense VPU slab adds
            sl = slice(c * _LANES, (c + 1) * _LANES)
            acc_d = acc_d + md[:, sl]
            acc_c = acc_c + mc[:, sl]
        accd_ref[...] = acc_d
        accc_ref[...] = acc_c

    # Same-label pairs live on three diagonals of the (N, N) matrix (col == row,
    # col == row +- B); padded columns are the tail col >= n_valid. Only tiles that can
    # touch one of those need the iota masks; all other tiles are pure negatives.
    row_lo = i * tm
    col_lo = j * tn

    def _hits(off):
        return jnp.logical_and(col_lo + (tn - 1) >= row_lo + off,
                               col_lo <= row_lo + (tm - 1) + off)

    needs_mask = jnp.logical_or(
        jnp.logical_or(_hits(0), jnp.logical_or(_hits(batch), _hits(-batch))),
        col_lo + tn > n_valid)

    @pl.when(needs_mask)
    def _masked():
        grow = row_lo + lax.broadcasted_iota(jnp.int32, (tm, tn), 0)
        gcol = col_lo + lax.broadcasted_iota(jnp.int32, (tm, tn), 1)
        bad = jnp.logical_or(
            jnp.logical_or(gcol == grow, gcol == grow + batch),
            jnp.logical_or(gcol == grow - batch, gcol >= n_valid))
        _accum(jnp.logical_and(window, jnp.logical_not(bad)))

    @pl.when(jnp.logical_not(needs_mask))
    def _plain():
        _accum(window)

    # Collapse the lane-dense accumulators to (tm, 1) and touch the narrow outputs only
    # once per row block (single XLU reduction + one masked store per row block).
    @pl.when(j == pl.num_programs(1) - 1)
    def _finalize():
        cnt = jnp.sum(accc_ref[...], axis=1, keepdims=True)
        sum_d = jnp.sum(accd_ref[...], axis=1, keepdims=True)
        cnt_ref[...] = cnt
        sum_ref[...] = cnt * mpd_ref[...] - sum_d


def triplet_loss(ref_emb, query_emb, margin=0.5):
    """Semihard-mined triplet margin loss of the concatenated, L2-normalized embeddings."""
    B, D = ref_emb.shape
    assert query_emb.shape == (B, D)
    N = 2 * B

    # ------------------ Stage 1: normalize + bf16 + window params ------------------
    tb = _stage1_tile(B)
    e2, lo2, hi2, mpd2 = pl.pallas_call(
        functools.partial(_prep_kernel, margin=float(margin)),
        out_shape=(
            jax.ShapeDtypeStruct((2, B, D), jnp.bfloat16),
            jax.ShapeDtypeStruct((2, B, 1), jnp.float32),
            jax.ShapeDtypeStruct((2, B, 1), jnp.float32),
            jax.ShapeDtypeStruct((2, B, 1), jnp.float32),
        ),
        grid=(B // tb,),
        in_specs=[
            pl.BlockSpec((tb, D), lambda i: (i, 0)),
            pl.BlockSpec((tb, D), lambda i: (i, 0)),
        ],
        out_specs=(
            pl.BlockSpec((2, tb, D), lambda i: (0, i, 0)),
            pl.BlockSpec((2, tb, 1), lambda i: (0, i, 0)),
            pl.BlockSpec((2, tb, 1), lambda i: (0, i, 0)),
            pl.BlockSpec((2, tb, 1), lambda i: (0, i, 0)),
        ),
        compiler_params=pltpu.CompilerParams(
            dimension_semantics=("parallel",),
            vmem_limit_bytes=_VMEM_LIMIT),
    )(ref_emb, query_emb)

    # (2, B, .) -> (N, .) are free row-major reshapes (replaces the old concatenate copies).
    e = e2.reshape(N, D)
    lo = lo2.reshape(N, 1)
    hi = hi2.reshape(N, 1)
    mpd = mpd2.reshape(N, 1)

    # ------------------ Stage 2: tiled semihard triplet reduction ------------------
    n_pad, tm, tn = _stage2_plan(N, D)
    if n_pad > N:
        pad = n_pad - N
        e = jnp.pad(e, ((0, pad), (0, 0)))                           # zero rows
        lo = jnp.pad(lo, ((0, pad), (0, 0)), constant_values=2.0)    # window never opens
        hi = jnp.pad(hi, ((0, pad), (0, 0)), constant_values=-2.0)
        mpd = jnp.pad(mpd, ((0, pad), (0, 0)))                       # cnt == 0 -> 0 * 0

    grid = (n_pad // tm, n_pad // tn)
    # TODO(synk): on v5e, pipeline_mode=pl.Buffered(3) on the (tn, D) stream could further
    # hide the DMA under the short per-tile compute.
    row_sum, row_cnt = pl.pallas_call(
        functools.partial(_triplet_kernel, batch=B, n_valid=N, tm=tm, tn=tn),
        out_shape=(
            jax.ShapeDtypeStruct((n_pad, 1), jnp.float32),
            jax.ShapeDtypeStruct((n_pad, 1), jnp.float32),
        ),
        grid=grid,
        in_specs=[
            pl.BlockSpec((tm, 1), lambda i, j: (i, 0)),   # lo_s
            pl.BlockSpec((tm, 1), lambda i, j: (i, 0)),   # hi_s
            pl.BlockSpec((tm, 1), lambda i, j: (i, 0)),   # margin + d_ap
            pl.BlockSpec((tm, D), lambda i, j: (i, 0)),   # anchor rows of e
            pl.BlockSpec((tn, D), lambda i, j: (j, 0)),   # candidate-negative rows of e
        ],
        out_specs=(
            pl.BlockSpec((tm, 1), lambda i, j: (i, 0)),   # per-row partial loss sums
            pl.BlockSpec((tm, 1), lambda i, j: (i, 0)),   # per-row mined-triplet counts
        ),
        scratch_shapes=[
            pltpu.VMEM((tm, _LANES), jnp.float32),        # lane-folded sum of masked d_an
            pltpu.VMEM((tm, _LANES), jnp.float32),        # lane-folded masked count
        ],
        compiler_params=pltpu.CompilerParams(
            dimension_semantics=("parallel", "arbitrary"),
            vmem_limit_bytes=_VMEM_LIMIT),
    )(lo, hi, mpd, e, e)

    # Tiny final combine (AvgNonZeroReducer: mean of positive losses, 0 if none).
    total = jnp.sum(row_sum)
    count = jnp.sum(row_cnt)
    return jnp.where(count > 0, total / jnp.maximum(count, 1.0), jnp.float32(0.0))


def _triplet_loss_ref(ref_emb, query_emb, margin=0.5):
    """Pure-JAX reference (same bf16 MXU operand rounding / cosine-space window as the kernel)."""
    B, D = ref_emb.shape
    N = 2 * B
    x = jnp.concatenate([ref_emb, query_emb], axis=0).astype(jnp.float32)
    e = x * lax.rsqrt(jnp.maximum(jnp.sum(x * x, axis=1, keepdims=True), 1e-24))
    eb = e.astype(jnp.bfloat16)
    s = jnp.dot(eb, eb.T, preferred_element_type=jnp.float32)
    pos = jnp.sum(eb[:B].astype(jnp.float32) * eb[B:].astype(jnp.float32), axis=1)
    d_ap = jnp.sqrt(jnp.maximum(2.0 - 2.0 * pos, 0.0))
    d_ap = jnp.concatenate([d_ap, d_ap])[:, None]
    hi = jnp.concatenate([pos, pos])[:, None]
    lo = 1.0 - 0.5 * (d_ap + margin) * (d_ap + margin)
    d_an = jnp.sqrt(jnp.maximum(2.0 - 2.0 * s, 0.0))
    row = jnp.arange(N)[:, None]
    col = jnp.arange(N)[None, :]
    same = (col == row) | (col == row + B) | (col == row - B)
    valid = (~same) & (s > lo) & (s < hi)
    total = jnp.sum(jnp.where(valid, margin + d_ap - d_an, 0.0))
    count = jnp.sum(valid.astype(jnp.float32))
    return jnp.where(count > 0, total / jnp.maximum(count, 1.0), jnp.float32(0.0))


if __name__ == "__main__":
    key = jax.random.PRNGKey(0)
    k1, k2 = jax.random.split(key)
    B, D = 4, 32
    ref_emb = jax.random.normal(k1, (B, D), dtype=jnp.float32)
    query_emb = jax.random.normal(k2, (B, D), dtype=jnp.float32)

    loss = triplet_loss(ref_emb, query_emb, margin=0.5)
    jax.block_until_ready(loss)

    expected = _triplet_loss_ref(ref_emb, query_emb, margin=0.5)
    assert jnp.isfinite(loss), loss
    assert jnp.allclose(loss, expected, rtol=1e-4, atol=1e-5), (loss, expected)

    print("KERNEL_OK")
</pallas_src>

<mosaic_0001>
module attributes {stable_mosaic.version = 11 : i64} {
  func.func @_prep_kernel(%arg0: i32, %arg1: memref<4x32xf32, #tpu.memory_space<vmem>>, %arg2: memref<4x32xf32, #tpu.memory_space<vmem>>, %arg3: memref<2x4x32xbf16, #tpu.memory_space<vmem>>, %arg4: memref<2x4x1xf32, #tpu.memory_space<vmem>>, %arg5: memref<2x4x1xf32, #tpu.memory_space<vmem>>, %arg6: memref<2x4x1xf32, #tpu.memory_space<vmem>>) attributes {dimension_semantics = [#tpu.dimension_semantics<parallel>], iteration_bounds = array<i64: 1>, scalar_prefetch = 0 : i64, scratch_operands = 0 : i64, tpu.core_type = #tpu.core_type<tc>, window_params = [{transform_indices = @transform_0, window_bounds = array<i64: 4, 32>}, {transform_indices = @transform_1, window_bounds = array<i64: 4, 32>}, {transform_indices = @transform_2, window_bounds = array<i64: 2, 4, 32>}, {transform_indices = @transform_3, window_bounds = array<i64: 2, 4, 1>}, {transform_indices = @transform_4, window_bounds = array<i64: 2, 4, 1>}, {transform_indices = @transform_5, window_bounds = array<i64: 2, 4, 1>}]} {
    %c0 = arith.constant 0 : index
    %c0_0 = arith.constant 0 : index
    %0 = vector.load %arg1[%c0, %c0_0] : memref<4x32xf32, #tpu.memory_space<vmem>>, vector<4x32xf32>
    %c0_1 = arith.constant 0 : index
    %c0_2 = arith.constant 0 : index
    %1 = vector.load %arg2[%c0_1, %c0_2] : memref<4x32xf32, #tpu.memory_space<vmem>>, vector<4x32xf32>
    %2 = arith.mulf %0, %0 : vector<4x32xf32>
    %cst = arith.constant dense<0.000000e+00> : vector<4xf32>
    %3 = vector.multi_reduction <add>, %2, %cst [1] : vector<4x32xf32> to vector<4xf32>
    %4 = vector.shape_cast %3 : vector<4xf32> to vector<4x1xf32>
    %cst_3 = arith.constant 1.000000e-24 : f32
    %5 = vector.broadcast %cst_3 : f32 to vector<4x1xf32>
    %6 = arith.maximumf %4, %5 : vector<4x1xf32>
    %7 = math.rsqrt %6 : vector<4x1xf32>
    %8 = vector.broadcast %7 : vector<4x1xf32> to vector<4x32xf32>
    %9 = arith.mulf %0, %8 : vector<4x32xf32>
    %10 = arith.mulf %1, %1 : vector<4x32xf32>
    %cst_4 = arith.constant dense<0.000000e+00> : vector<4xf32>
    %11 = vector.multi_reduction <add>, %10, %cst_4 [1] : vector<4x32xf32> to vector<4xf32>
    %12 = vector.shape_cast %11 : vector<4xf32> to vector<4x1xf32>
    %cst_5 = arith.constant 1.000000e-24 : f32
    %13 = vector.broadcast %cst_5 : f32 to vector<4x1xf32>
    %14 = arith.maximumf %12, %13 : vector<4x1xf32>
    %15 = math.rsqrt %14 : vector<4x1xf32>
    %16 = vector.broadcast %15 : vector<4x1xf32> to vector<4x32xf32>
    %17 = arith.mulf %1, %16 : vector<4x32xf32>
    %18 = arith.truncf %9 : vector<4x32xf32> to vector<4x32xbf16>
    %19 = arith.truncf %17 : vector<4x32xf32> to vector<4x32xbf16>
    %c0_6 = arith.constant 0 : index
    %c0_7 = arith.constant 0 : index
    %c0_8 = arith.constant 0 : index
    %20 = vector.load %arg3[%c0_6, %c0_7, %c0_8] : memref<2x4x32xbf16, #tpu.memory_space<vmem>>, vector<1x4x32xbf16>
    %21 = vector.shape_cast %20 : vector<1x4x32xbf16> to vector<4x32xbf16>
    %22 = vector.shape_cast %18 : vector<4x32xbf16> to vector<1x4x32xbf16>
    tpu.vector_store %arg3[%c0_6, %c0_7, %c0_8], %22 {strides = array<i32>} : memref<2x4x32xbf16, #tpu.memory_space<vmem>>, vector<1x4x32xbf16>,
    %c1 = arith.constant 1 : index
    %c0_9 = arith.constant 0 : index
    %c0_10 = arith.constant 0 : index
    %23 = vector.load %arg3[%c1, %c0_9, %c0_10] : memref<2x4x32xbf16, #tpu.memory_space<vmem>>, vector<1x4x32xbf16>
    %24 = vector.shape_cast %23 : vector<1x4x32xbf16> to vector<4x32xbf16>
    %25 = vector.shape_cast %19 : vector<4x32xbf16> to vector<1x4x32xbf16>
    tpu.vector_store %arg3[%c1, %c0_9, %c0_10], %25 {strides = array<i32>} : memref<2x4x32xbf16, #tpu.memory_space<vmem>>, vector<1x4x32xbf16>,
    %26 = arith.extf %18 : vector<4x32xbf16> to vector<4x32xf32>
    %27 = arith.extf %19 : vector<4x32xbf16> to vector<4x32xf32>
    %28 = arith.mulf %26, %27 : vector<4x32xf32>
    %cst_11 = arith.constant dense<0.000000e+00> : vector<4xf32>
    %29 = vector.multi_reduction <add>, %28, %cst_11 [1] : vector<4x32xf32> to vector<4xf32>
    %30 = vector.shape_cast %29 : vector<4xf32> to vector<4x1xf32>
    %cst_12 = arith.constant 2.000000e+00 : f32
    %31 = vector.broadcast %cst_12 : f32 to vector<4x1xf32>
    %32 = arith.mulf %31, %30 : vector<4x1xf32>
    %cst_13 = arith.constant 2.000000e+00 : f32
    %33 = vector.broadcast %cst_13 : f32 to vector<4x1xf32>
    %34 = arith.subf %33, %32 : vector<4x1xf32>
    %cst_14 = arith.constant 0.000000e+00 : f32
    %35 = vector.broadcast %cst_14 : f32 to vector<4x1xf32>
    %36 = arith.maximumf %34, %35 : vector<4x1xf32>
    %37 = math.sqrt %36 : vector<4x1xf32>
    %cst_15 = arith.constant 5.000000e-01 : f32
    %38 = vector.broadcast %cst_15 : f32 to vector<4x1xf32>
    %39 = arith.addf %37, %38 : vector<4x1xf32>
    %cst_16 = arith.constant 5.000000e-01 : f32
    %40 = vector.broadcast %cst_16 : f32 to vector<4x1xf32>
    %41 = arith.mulf %40, %39 : vector<4x1xf32>
    %cst_17 = arith.constant 5.000000e-01 : f32
    %42 = vector.broadcast %cst_17 : f32 to vector<4x1xf32>
    %43 = arith.addf %37, %42 : vector<4x1xf32>
    %44 = arith.mulf %41, %43 : vector<4x1xf32>
    %cst_18 = arith.constant 1.000000e+00 : f32
    %45 = vector.broadcast %cst_18 : f32 to vector<4x1xf32>
    %46 = arith.subf %45, %44 : vector<4x1xf32>
    %cst_19 = arith.constant 5.000000e-01 : f32
    %47 = vector.broadcast %cst_19 : f32 to vector<4x1xf32>
    %48 = arith.addf %37, %47 : vector<4x1xf32>
    %c0_20 = arith.constant 0 : index
    %c0_21 = arith.constant 0 : index
    %c0_22 = arith.constant 0 : index
    %49 = vector.load %arg4[%c0_20, %c0_21, %c0_22] : memref<2x4x1xf32, #tpu.memory_space<vmem>>, vector<1x4x1xf32>
    %50 = vector.shape_cast %49 : vector<1x4x1xf32> to vector<4x1xf32>
    %51 = vector.shape_cast %46 : vector<4x1xf32> to vector<1x4x1xf32>
    tpu.vector_store %arg4[%c0_20, %c0_21, %c0_22], %51 {strides = array<i32>} : memref<2x4x1xf32, #tpu.memory_space<vmem>>, vector<1x4x1xf32>,
    %c1_23 = arith.constant 1 : index
    %c0_24 = arith.constant 0 : index
    %c0_25 = arith.constant 0 : index
    %52 = vector.load %arg4[%c1_23, %c0_24, %c0_25] : memref<2x4x1xf32, #tpu.memory_space<vmem>>, vector<1x4x1xf32>
    %53 = vector.shape_cast %52 : vector<1x4x1xf32> to vector<4x1xf32>
    %54 = vector.shape_cast %46 : vector<4x1xf32> to vector<1x4x1xf32>
    tpu.vector_store %arg4[%c1_23, %c0_24, %c0_25], %54 {strides = array<i32>} : memref<2x4x1xf32, #tpu.memory_space<vmem>>, vector<1x4x1xf32>,
    %c0_26 = arith.constant 0 : index
    %c0_27 = arith.constant 0 : index
    %c0_28 = arith.constant 0 : index
    %55 = vector.load %arg5[%c0_26, %c0_27, %c0_28] : memref<2x4x1xf32, #tpu.memory_space<vmem>>, vector<1x4x1xf32>
    %56 = vector.shape_cast %55 : vector<1x4x1xf32> to vector<4x1xf32>
    %57 = vector.shape_cast %30 : vector<4x1xf32> to vector<1x4x1xf32>
    tpu.vector_store %arg5[%c0_26, %c0_27, %c0_28], %57 {strides = array<i32>} : memref<2x4x1xf32, #tpu.memory_space<vmem>>, vector<1x4x1xf32>,
    %c1_29 = arith.constant 1 : index
    %c0_30 = arith.constant 0 : index
    %c0_31 = arith.constant 0 : index
    %58 = vector.load %arg5[%c1_29, %c0_30, %c0_31] : memref<2x4x1xf32, #tpu.memory_space<vmem>>, vector<1x4x1xf32>
    %59 = vector.shape_cast %58 : vector<1x4x1xf32> to vector<4x1xf32>
    %60 = vector.shape_cast %30 : vector<4x1xf32> to vector<1x4x1xf32>
    tpu.vector_store %arg5[%c1_29, %c0_30, %c0_31], %60 {strides = array<i32>} : memref<2x4x1xf32, #tpu.memory_space<vmem>>, vector<1x4x1xf32>,
    %c0_32 = arith.constant 0 : index
    %c0_33 = arith.constant 0 : index
    %c0_34 = arith.constant 0 : index
    %61 = vector.load %arg6[%c0_32, %c0_33, %c0_34] : memref<2x4x1xf32, #tpu.memory_space<vmem>>, vector<1x4x1xf32>
    %62 = vector.shape_cast %61 : vector<1x4x1xf32> to vector<4x1xf32>
    %63 = vector.shape_cast %48 : vector<4x1xf32> to vector<1x4x1xf32>
    tpu.vector_store %arg6[%c0_32, %c0_33, %c0_34], %63 {strides = array<i32>} : memref<2x4x1xf32, #tpu.memory_space<vmem>>, vector<1x4x1xf32>,
    %c1_35 = arith.constant 1 : index
    %c0_36 = arith.constant 0 : index
    %c0_37 = arith.constant 0 : index
    %64 = vector.load %arg6[%c1_35, %c0_36, %c0_37] : memref<2x4x1xf32, #tpu.memory_space<vmem>>, vector<1x4x1xf32>
    %65 = vector.shape_cast %64 : vector<1x4x1xf32> to vector<4x1xf32>
    %66 = vector.shape_cast %48 : vector<4x1xf32> to vector<1x4x1xf32>
    tpu.vector_store %arg6[%c1_35, %c0_36, %c0_37], %66 {strides = array<i32>} : memref<2x4x1xf32, #tpu.memory_space<vmem>>, vector<1x4x1xf32>,
    return
  }
  func.func @transform_0(%arg0: i32) -> (i32, i32) {
    %c0_i32 = arith.constant 0 : i32
    %c0_i32_0 = arith.constant 0 : i32
    return %arg0, %c0_i32 : i32, i32
  }
  func.func @transform_1(%arg0: i32) -> (i32, i32) {
    %c0_i32 = arith.constant 0 : i32
    %c0_i32_0 = arith.constant 0 : i32
    return %arg0, %c0_i32 : i32, i32
  }
  func.func @transform_2(%arg0: i32) -> (i32, i32, i32) {
    %c0_i32 = arith.constant 0 : i32
    %c0_i32_0 = arith.constant 0 : i32
    %c0_i32_1 = arith.constant 0 : i32
    return %c0_i32, %arg0, %c0_i32_0 : i32, i32, i32
  }
  func.func @transform_3(%arg0: i32) -> (i32, i32, i32) {
    %c0_i32 = arith.constant 0 : i32
    %c0_i32_0 = arith.constant 0 : i32
    %c0_i32_1 = arith.constant 0 : i32
    return %c0_i32, %arg0, %c0_i32_0 : i32, i32, i32
  }
  func.func @transform_4(%arg0: i32) -> (i32, i32, i32) {
    %c0_i32 = arith.constant 0 : i32
    %c0_i32_0 = arith.constant 0 : i32
    %c0_i32_1 = arith.constant 0 : i32
    return %c0_i32, %arg0, %c0_i32_0 : i32, i32, i32
  }
  func.func @transform_5(%arg0: i32) -> (i32, i32, i32) {
    %c0_i32 = arith.constant 0 : i32
    %c0_i32_0 = arith.constant 0 : i32
    %c0_i32_1 = arith.constant 0 : i32
    return %c0_i32, %arg0, %c0_i32_0 : i32, i32, i32
  }
}

</mosaic_0001>

<bundles_post_ra>
// kernel: tpu_custom_call.1
= control target key start
LH: loop header
LB: loop body
LE: loop exit
PB: predicated region body
PF: predicated region fallthrough
CT: control target
= control target key end

     0   :  { %11 = vsyncpa [#allocation3], 0  ;;  %s307_s0 = inlined_call_operand.hbm [shape: f32[4,32], index: 0, kind: input, shape index: {}]   ;;  %s308_s1 = inlined_call_operand.hbm [shape: f32[4,32], index: 1, kind: input, shape index: {}]   ;;  %s309_s2 = inlined_call_operand.hbm [shape: bf16[2,4,32], index: 2, kind: output, shape index: {0}]   ;;  %s310_s3 = inlined_call_operand.vmem [shape: f32[2,4,1], index: 3, kind: output, shape index: {1}]   ;;  %s311_s4 = inlined_call_operand.vmem [shape: f32[2,4,1], index: 4, kind: output, shape index: {2}]   ;;  %s312_s5 = inlined_call_operand.vmem [shape: f32[2,4,1], index: 5, kind: output, shape index: {3}]  }
   0x1   :  { %12 = vsyncpa [#allocation6], 0 }
   0x2   :  { %13 = vsyncpa [#allocation4], 0  ;;  %s209_s18 = smov [#allocation2]   ;;  %s210_s20 = smov [#allocation5]  }
   0x3   :  { %s20_s19 = sshll.u32 %s209_s18, 4  ;;  %s30_s21 = sshll.u32 %s210_s20, 4  ;;  %s21_s19 = int_to_ptr.vmem [resolvable:$true] %s20_s19  ;;  %s31_s21 = int_to_ptr.vmem [resolvable:$true] %s30_s21 }
   0x4   :  { %s137_s24 = scalar_lea.hbm %s307_s0, 64 }
   0x5   :  { %p138_p0 = scmp.ne.s32.totalorder %s307_s0, %s137_s24  ;;  %p141_p1 = scmp.lt.u32.totalorder %s137_s24, %s307_s0 }
   0x7   :  { %p143_p2 = pnand %p141_p1, %p138_p0 }
   0x9   :  { %146 = shalt.err (!%p143_p2)
}
   0xa   :  { %s147_s29 = scalar_lea.vmem %s21_s19, 64  ;;  %p152_p4 = scmp.lt.s32.totalorder %s21_s19, %s21_s19 }
   0xb   :  { %p148_p3 = scmp.ne.s32.totalorder %s21_s19, %s147_s29  ;;  %p153_p5 = scmp.lt.s32.totalorder %s147_s29, %s147_s29 }
   0xd   :  { %p154_p6 = por %p153_p5, %p152_p4 }
   0xf   :  { %p155_p7 = pnand %p154_p6, %p148_p3 }
  0x11   :  { %158 = shalt.err (!%p155_p7)
}
  0x12   :  { %23 = dma.hbm_to_vmem [thread:$0]  %s307_s0, 64, %s21_s19, [#allocation3]  }
  0x13   :  { %s159_s9 = scalar_lea.hbm %s308_s1, 64 }
  0x14   :  { %p160_p8 = scmp.ne.s32.totalorder %s308_s1, %s159_s9  ;;  %p163_p9 = scmp.lt.u32.totalorder %s159_s9, %s308_s1 }
  0x16   :  { %p165_p10 = pnand %p163_p9, %p160_p8 }
  0x18   :  { %168 = shalt.err (!%p165_p10)
}
  0x19   :  { %s169_s14 = scalar_lea.vmem %s31_s21, 64  ;;  %p174_p12 = scmp.lt.s32.totalorder %s31_s21, %s31_s21 }
  0x1a   :  { %p170_p11 = scmp.ne.s32.totalorder %s31_s21, %s169_s14  ;;  %p175_p13 = scmp.lt.s32.totalorder %s169_s14, %s169_s14 }
  0x1c   :  { %p176_p0 = por %p175_p13, %p174_p12 }
  0x1e   :  { %p177_p1 = pnand %p176_p0, %p170_p11 }
  0x20   :  { %180 = shalt.err (!%p177_p1)
}
  0x21   :  { %33 = dma.hbm_to_vmem [thread:$0]  %s308_s1, 64, %s31_s21, [#allocation6]  }
  0x22   :  { %203 = dma.done.wait [#allocation3], 64  }
  0x23   :  { %204 = vsyncadd [#allocation3], 4294967232 }
  0x24   :  { %205 = dma.done.wait [#allocation6], 64  }
  0x25   :  { %206 = vsyncadd [#allocation6], 4294967232  ;;  %v40_v0 = vld [vmem:[#allocation2] sm:$0xf]  ;;  %vm43_vm0 = vcmask 257024   ;;  %vm59_vm1 = vcmask 254976  }
  0x26   :  { %v41_v1 = vld [vmem:[#allocation5] sm:$0xf]  ;;  %v42_v2 = vmul.f32 %v40_v0, %v40_v0  ;;  %s211_s1 = smov [#allocation7]  }
  0x27   :  { %v50_v3 = vmul.f32 %v41_v1, %v41_v1  ;;  %s98_s16 = sshll.u32 %s211_s1, 4  ;;  %s99_s16 = int_to_ptr.vmem [resolvable:$true] %s98_s16 }
  0x28   :  { %v44_v4 = vsel %vm43_vm0, %v42_v2, 0.0  ;;  %s181_s17 = scalar_lea.vmem %s99_s16, 64  ;;  %p186_p3 = scmp.lt.s32.totalorder %s99_s16, %s99_s16 }
  0x29   :  { %45 = vadd.xlane.f32.xlu0 %v44_v4  ;;  %v51_v5 = vsel %vm43_vm0, %v50_v3, 0.0  ;;  %p182_p2 = scmp.ne.s32.totalorder %s99_s16, %s181_s17  ;;  %p187_p4 = scmp.lt.s32.totalorder %s181_s17, %s181_s17 }
  0x2b   :  { %p188_p5 = por %p187_p4, %p186_p3 }
  0x2d   :  { %52 = vadd.xlane.f32.xlu0 %v51_v5  ;;  %p189_p6 = pnand %p188_p5, %p182_p2 }
  0xb6   :  { %v46_v6 = vpop.xlane.xlu0 %45 }
  0xb7   :  { %v47_v7 = vmax.f32 %v46_v6, 1e-24 }
  0xb9   :  { %131 = vrsqrt.f32 %v47_v7 }
  0xba   :  { %v53_v8 = vpop.xlane.xlu0 %52 }
  0xbb   :  { %v54_v9 = vmax.f32 %v53_v8, 1e-24 }
  0xbd   :  { %133 = vrsqrt.f32 %v54_v9 }
  0xc3   :  { %v132_v10 = vpop.eup %131 }
  0xc4   :  { %v49_v11 = vmul.f32 %v132_v10, %v40_v0 }
  0xc6   :  { %v57_v12 = vpack.c.bf16 %v49_v11, %v49_v11 }
  0xc7   :  { %v134_v13 = vpop.eup %133 }
  0xc8   :  { %v56_v14 = vmul.f32 %v134_v13, %v41_v1  ;;  %60 = vst.msk [vmem:[#allocation7] sm:$0x3] %vm59_vm1, %v57_v12  ;;  %v63_v16 = vunpack.c.l.bf16 %v57_v12 }
  0xca   :  { %v58_v15 = vpack.c.bf16 %v56_v14, %v56_v14 }
  0xcc   :  { %v64_v17 = vunpack.c.l.bf16 %v58_v15  ;;  %62 = vst.msk [vmem:[#allocation7 + $0x2] sm:$0x3] %vm59_vm1, %v58_v15 }
  0xce   :  { %v65_v18 = vmul.f32 %v64_v17, %v63_v16 }
  0xd0   :  { %v66_v19 = vsel %vm43_vm0, %v65_v18, 0.0 }
  0xd1   :  { %67 = vadd.xlane.f32.xlu1 %v66_v19 }
  0xd2   :  { %192 = shalt.err (!%p189_p6)
}
  0xd3   :  { %s193_s20 = scalar_lea.hbm %s309_s2, 64 }
  0xd4   :  { %p194_p7 = scmp.ne.s32.totalorder %s309_s2, %s193_s20  ;;  %p197_p8 = scmp.lt.u32.totalorder %s193_s20, %s309_s2 }
  0xd6   :  { %p199_p9 = pnand %p197_p8, %p194_p7 }
  0xd8   :  { %202 = shalt.err (!%p199_p9)
}
  0xd9   :  { %s212_s25 = smov 32   ;;  %s213_s26 = smov 2   ;;  %vm83_vm2 = vcmask 3072  }
  0xda   :  { %104 = dma.vmem_to_hbm [thread:$0]  %s99_s16, 64, %s309_s2, [#allocation4], %s212_s25, %s212_s25, %s213_s26  }
 0x15e   :  { %v68_v20 = vpop.xlane.xlu1 %67 }
 0x15f   :  { %v69_v21 = vmul.f32 2.0, %v68_v20  ;;  %87 = vst.msk [vmem:[%s311_s4] sm:$0xf] %vm83_vm2, %v68_v20  ;;  %124 = vst.msk [vmem:[%s311_s4 + $0x4] sm:$0xf] %vm83_vm2, %v68_v20 }
 0x161   :  { %v70_v22 = vsub.f32 2.0, %v69_v21 }
 0x163   :  { %v71_v23 = vmax.f32 %v70_v22, 0.0 }
 0x165   :  { %135 = vrsqrt.f32 %v71_v23  ;;  %vm74_vm3 = vcmp.eq.f32.partialorder %v71_v23, inf  ;;  %v77_v26 = vand.u32 2147483648, %v71_v23  ;;  %vm76_vm4 = vcmp.eq.f32.partialorder %v71_v23, 0.0 }
 0x16f   :  { %v136_v24 = vpop.eup %135 }
 0x170   :  { %v73_v25 = vmul.f32 %v136_v24, %v71_v23 }
 0x172   :  { %v75_v27 = vsel %vm74_vm3, %v71_v23, %v73_v25 }
 0x173   :  { %v78_v28 = vsel %vm76_vm4, %v77_v26, %v75_v27 }
 0x174   :  { %v79_v29 = vadd.f32 0.5, %v78_v28 }
 0x176   :  { %v80_v30 = vmul.f32 0.5, %v79_v29  ;;  %90 = vst.msk [vmem:[%s312_s5] sm:$0xf] %vm83_vm2, %v79_v29  ;;  %125 = vst.msk [vmem:[%s312_s5 + $0x4] sm:$0xf] %vm83_vm2, %v79_v29 }
 0x178   :  { %v81_v31 = vmul.f32 %v80_v30, %v79_v29 }
 0x17a   :  { %v82_v32 = vsub.f32 1.0, %v81_v31 }
 0x17c   :  { %84 = vst.msk [vmem:[%s310_s3] sm:$0xf] %vm83_vm2, %v82_v32  ;;  %123 = vst.msk [vmem:[%s310_s3 + $0x4] sm:$0xf] %vm83_vm2, %v82_v32 }
 0x17d   :  { %207 = dma.done.wait [#allocation4], 64  }
 0x17e   :  { %208 = vsyncadd [#allocation4], 4294967232 }
 0x17f   :  { %120 = vsyncpa [#allocation3], 1 }
 0x180   :  { %121 = vsyncpa [#allocation6], 1 }
 0x181   :  { %122 = vsyncpa [#allocation4], 1 }

</bundles_post_ra>
